<compile_context>
chip_gen: v7x
topology: tpu7x:2x2x1
jax: 0.10.0
libtpu: 0.0.40
codegen_flags: <defaults>
</compile_context>

<pallas_src>
import jax
import jax.numpy as jnp
from jax.experimental import pallas as pl
from jax.experimental.pallas import tpu as pltpu


C1 = 64              # edge_conv output channels
C2 = 128             # edge_conv1 output channels
K_TAPS = 27          # 3x3 spatial taps * 3 input channels
K_PIX = 32           # per-pixel packed contraction (27 real + 5 zero pad)
K_PAIR = 2 * K_PIX   # even+odd column pair packed along the contraction
CP = 2 * C1          # 128: parity-packed conv1 channels (== NHWC pair layout)


def _make_kernel(TH, Wh):
    """Fused conv1(3x3,s1,p1)+ReLU and conv2(3x3,s2,p1)+ReLU for one row tile."""
    M1 = TH * Wh
    TH2 = TH // 2
    M2 = TH2 * Wh

    def kernel(x_ref, halo_ref, w1_ref, b1_ref, w2c_ref, w2l_ref, b2_ref,
               ef_ref, ef1_ref):
        # ---------- conv1: single block-diagonal matmul (taps packed in K) ----
        # x_ref:  (1, TH, Wh, K_PAIR) bf16 -- per-column-pair im2col.
        # w1_ref: (K_PAIR, CP) bf16 block-diagonal: output lanes 0:64 = even
        #         column's 64 channels, lanes 64:128 = odd column's channels.
        x = x_ref[...].reshape(M1, K_PAIR)
        acc1 = jnp.dot(x, w1_ref[...], preferred_element_type=jnp.float32)
        ef = jnp.maximum(acc1 + b1_ref[...], 0.0)            # (M1, CP) f32

        # Parity-packed (TH, Wh, 128) is bit-identical to NHWC (TH, 2*Wh, 64):
        # lane-dense bf16 store, and no re-interleave pass is needed outside.
        ef_ref[...] = ef.astype(ef_ref.dtype).reshape(1, TH, Wh, CP)

        # ---------- conv1 halo row (last row of the previous tile) ------------
        # Recomputed from a 1-row im2col input; zeroed on the first row tile
        # (there it is conv2's zero padding, not a conv1 value).
        h = jnp.dot(halo_ref[0, 0], w1_ref[...],
                    preferred_element_type=jnp.float32)
        h = jnp.maximum(h + b1_ref[...], 0.0)
        h = h * (pl.program_id(1) > 0).astype(jnp.float32)   # (Wh, CP)

        # ---------- column-shifted copies for conv2's dx=0 taps ---------------
        # shifted[:, j] = unshifted[:, j-1]; column 0 becomes the zero pad.
        ef3 = ef.reshape(TH, Wh, CP)
        ef3_s = jnp.concatenate(
            [jnp.zeros((TH, 1, CP), jnp.float32), ef3[:, :Wh - 1, :]], axis=1)
        h_s = jnp.concatenate(
            [jnp.zeros((1, CP), jnp.float32), h[:Wh - 1, :]], axis=0)

        # ---------- row-parity split (free leading-dim reshape / slices) ------
        ef4 = ef3.reshape(TH2, 2, Wh, CP)
        ef4_s = ef3_s.reshape(TH2, 2, Wh, CP)
        even, odd = ef4[:, 0], ef4[:, 1]              # conv1 rows 2r / 2r+1
        even_s, odd_s = ef4_s[:, 0], ef4_s[:, 1]
        if TH2 > 1:                                   # conv1 rows 2r-1 (w/ halo)
            up = jnp.concatenate([h[None], odd[:TH2 - 1]], axis=0)
            up_s = jnp.concatenate([h_s[None], odd_s[:TH2 - 1]], axis=0)
        else:
            up, up_s = h[None], h_s[None]

        def mm(a, w):
            return jnp.dot(a.astype(jnp.bfloat16).reshape(M2, CP), w,
                           preferred_element_type=jnp.float32)

        # ---------- conv2: 6 lane-dense K=128 matmuls (taps paired along K) ---
        # w2c[dy] stacks the dx=1 and dx=2 weights (conv1 cols 2j, 2j+1);
        # w2l[dy] carries the dx=0 weight in its lower half (conv1 col 2j-1).
        acc2 = (mm(up, w2c_ref[0]) + mm(up_s, w2l_ref[0])
                + mm(even, w2c_ref[1]) + mm(even_s, w2l_ref[1])
                + mm(odd, w2c_ref[2]) + mm(odd_s, w2l_ref[2]))
        out2 = jnp.maximum(acc2 + b2_ref[...], 0.0)
        ef1_ref[...] = out2.astype(ef1_ref.dtype).reshape(1, TH2, Wh, C2)

    return kernel


def _pick_tile_rows(H, Wh, max_pixels=4096):
    """Largest even row tile dividing H with a bounded pixel count; prefer >=2
    row tiles so a v7x megacore has parallel work even at batch 1."""
    th = 2
    for cand in range(2, H + 1, 2):
        if H % cand == 0 and cand * Wh <= max_pixels:
            th = cand
    if th == H and H >= 4 and (H // 2) % 2 == 0:
        th = H // 2
    return th


def conv_edge_fused(rgb, params):
    """rgb: (B, H, W, 3) f32 NHWC.  Returns (edge_feat, edge_feat1), bf16 NHWC."""
    B, H, W, cin = rgb.shape
    assert cin == 3
    # TODO(synk): odd H/W would need explicit pad handling; NVDS frames are even.
    assert H % 2 == 0 and W % 2 == 0
    Hh, Wh = H // 2, W // 2
    TH = _pick_tile_rows(H, Wh)
    n_tiles = H // TH

    w1, b1 = params["w1"], params["b1"]        # (3,3,3,64) HWIO, (64,)
    w2, b2 = params["w2"], params["b2"]        # (3,3,64,128) HWIO, (128,)

    # ---- wrapper-side tap concat (im2col) : tiny vs. the outputs ------------
    # x_pair[b, y, j, 0:27]  = 3x3x3 receptive field of conv1 output (y, 2j)
    # x_pair[b, y, j, 32:59] = 3x3x3 receptive field of conv1 output (y, 2j+1)
    xpad = jnp.pad(rgb, ((0, 0), (1, 1), (1, 1), (0, 0)))
    taps = [xpad[:, dy:dy + H, dx:dx + W, :] for dy in range(3) for dx in range(3)]
    col = jnp.concatenate(taps, axis=-1)                       # (B,H,W,27)
    col = jnp.pad(col, ((0, 0), (0, 0), (0, 0), (0, K_PIX - K_TAPS)))
    x_pair = jnp.concatenate([col[:, :, 0::2, :], col[:, :, 1::2, :]],
                             axis=-1).astype(jnp.bfloat16)     # (B,H,Wh,K_PAIR)

    # one im2col row per row tile = the previous tile's last conv1 row (halo)
    halo_rows = x_pair[:, TH - 1::TH]                          # (B,n_tiles,Wh,K_PAIR)
    halo = jnp.concatenate(
        [jnp.zeros_like(halo_rows[:, :1]), halo_rows[:, :n_tiles - 1]], axis=1)

    # ---- weights: conv1 block-diagonal pair; conv2 K-paired per dy ----------
    w1k = jnp.pad(w1.reshape(K_TAPS, C1), ((0, K_PIX - K_TAPS), (0, 0)))
    zk = jnp.zeros((K_PIX, C1), w1k.dtype)
    w1blk = jnp.concatenate(
        [jnp.concatenate([w1k, zk], axis=1),
         jnp.concatenate([zk, w1k], axis=1)], axis=0).astype(jnp.bfloat16)  # (64,128)
    b1p = jnp.concatenate([b1, b1]).reshape(1, CP).astype(jnp.float32)

    zc1 = jnp.zeros((C1, C2), w2.dtype)
    w2c = jnp.stack([jnp.concatenate([w2[dy, 1], w2[dy, 2]], axis=0)
                     for dy in range(3)]).astype(jnp.bfloat16)   # (3,128,128)
    w2l = jnp.stack([jnp.concatenate([zc1, w2[dy, 0]], axis=0)
                     for dy in range(3)]).astype(jnp.bfloat16)   # (3,128,128)
    b2p = b2.reshape(1, C2).astype(jnp.float32)

    # ---- cost / VMEM accounting ---------------------------------------------
    flops = 2 * B * (H * Wh * K_PAIR * CP + Hh * Wh * 6 * CP * C2)
    bytes_accessed = (
        x_pair.size * 2 + halo.size * 2
        + (w1blk.size + w2c.size + w2l.size) * 2 + (b1p.size + b2p.size) * 4
        + (B * H * Wh * CP + B * Hh * Wh * C2) * 2)             # bf16 outputs
    blk_bytes = 2 * (TH * Wh * K_PAIR * 2 + Wh * K_PAIR * 2
                     + TH * Wh * CP * 2 + (TH // 2) * Wh * C2 * 2)   # dbl-buffered
    wgt_bytes = 2 * ((K_PAIR * CP + 6 * CP * C2) * 2 + (CP + C2) * 4)
    live_bytes = 10 * TH * Wh * CP * 4                           # in-kernel f32 temps
    vmem_limit = int(min(max(2 * (blk_bytes + wgt_bytes) + live_bytes,
                             8 * 2 ** 20), 48 * 2 ** 20))

    ef_packed, ef1 = pl.pallas_call(
        _make_kernel(TH, Wh),
        out_shape=(
            jax.ShapeDtypeStruct((B, H, Wh, CP), jnp.bfloat16),
            jax.ShapeDtypeStruct((B, Hh, Wh, C2), jnp.bfloat16),
        ),
        grid_spec=pltpu.PrefetchScalarGridSpec(
            num_scalar_prefetch=0,
            grid=(B, n_tiles),
            in_specs=[
                pl.BlockSpec((1, TH, Wh, K_PAIR), lambda b, t: (b, t, 0, 0)),
                pl.BlockSpec((1, 1, Wh, K_PAIR), lambda b, t: (b, t, 0, 0)),
                pl.BlockSpec((K_PAIR, CP), lambda b, t: (0, 0)),
                pl.BlockSpec((1, CP), lambda b, t: (0, 0)),
                pl.BlockSpec((3, CP, C2), lambda b, t: (0, 0, 0)),
                pl.BlockSpec((3, CP, C2), lambda b, t: (0, 0, 0)),
                pl.BlockSpec((1, C2), lambda b, t: (0, 0)),
            ],
            out_specs=[
                pl.BlockSpec((1, TH, Wh, CP), lambda b, t: (b, t, 0, 0)),
                pl.BlockSpec((1, TH // 2, Wh, C2), lambda b, t: (b, t, 0, 0)),
            ],
        ),
        compiler_params=pltpu.CompilerParams(
            dimension_semantics=("parallel", "parallel"),
            vmem_limit_bytes=vmem_limit),
        cost_estimate=pl.CostEstimate(
            flops=flops, transcendentals=0, bytes_accessed=bytes_accessed),
    )(x_pair, halo, w1blk, b1p, w2c, w2l, b2p)

    # The parity-packed (B,H,Wh,128) buffer has exactly the NHWC (B,H,W,64)
    # memory layout, so this reshape is a free bitcast (no extra HBM pass).
    edge_feat = ef_packed.reshape(B, H, W, C1)
    return edge_feat, ef1


def nvds_edge_forward(inputs, params):
    """inputs: (B, T, C, H, W) float32 clip tensor (PyTorch NCHW-style)."""
    # inputs[:, -1, 0:-1]: last frame, all-but-last channel (RGB); NCHW -> NHWC.
    rgb = jnp.transpose(inputs[:, -1, 0:-1, :, :], (0, 2, 3, 1))
    edge_feat, edge_feat1 = conv_edge_fused(rgb, params)
    # TODO(synk): mit_b5 backbone and Stabilization_Network_Cross_Attention are
    # not computable from the provided source; their final F.relu matches the
    # fused-ReLU pattern used in-kernel here.
    return edge_feat, edge_feat1


def init_params(key):
    k1, k2, k3, k4 = jax.random.split(key, 4)
    return {
        # edge_conv:  Conv2d(3 -> 64, k=3, s=1, p=1)   (HWIO)
        "w1": 0.05 * jax.random.normal(k1, (3, 3, 3, 64), jnp.float32),
        "b1": 0.01 * jax.random.normal(k2, (64,), jnp.float32),
        # edge_conv1: Conv2d(64 -> 128, k=3, s=2, p=1) (HWIO)
        "w2": 0.05 * jax.random.normal(k3, (3, 3, 64, 128), jnp.float32),
        "b2": 0.01 * jax.random.normal(k4, (128,), jnp.float32),
    }


def _conv_ref(x, w, b, stride):
    """Plain-XLA reference: conv + bias + ReLU (NHWC / HWIO)."""
    y = jax.lax.conv_general_dilated(
        x, w, window_strides=(stride, stride), padding=((1, 1), (1, 1)),
        dimension_numbers=("NHWC", "HWIO", "NHWC"),
        precision=jax.lax.Precision.HIGHEST)
    return jnp.maximum(y + b, 0.0)


if __name__ == "__main__":
    key = jax.random.PRNGKey(0)
    kp, kx = jax.random.split(key)
    params = init_params(kp)

    # Clip tensor: batch=2, seq_len=4 frames, 4 channels (RGB + 1), 16x16.
    B, T, C, H, W = 2, 4, 4, 16, 16
    inputs = jax.random.normal(kx, (B, T, C, H, W), jnp.float32)

    edge_feat, edge_feat1 = jax.jit(nvds_edge_forward)(inputs, params)
    jax.block_until_ready((edge_feat, edge_feat1))

    assert edge_feat.shape == (B, H, W, C1)
    assert edge_feat1.shape == (B, H // 2, W // 2, C2)
    assert bool(jnp.all(edge_feat >= 0)) and bool(jnp.all(edge_feat1 >= 0))

    # Numerical check against plain-XLA convolutions (bf16 operands/outputs).
    rgb = jnp.transpose(inputs[:, -1, 0:-1, :, :], (0, 2, 3, 1))
    ref1 = _conv_ref(rgb, params["w1"], params["b1"], 1)
    ref2 = _conv_ref(ref1, params["w2"], params["b2"], 2)
    err1 = float(jnp.max(jnp.abs(edge_feat.astype(jnp.float32) - ref1)))
    err2 = float(jnp.max(jnp.abs(edge_feat1.astype(jnp.float32) - ref2)))
    assert err1 < 5e-2 and err2 < 5e-2, (err1, err2)

    print("KERNEL_OK")
</pallas_src>

<mosaic_0001>
module attributes {stable_mosaic.version = 11 : i64} {
  func.func @kernel(%arg0: i32, %arg1: i32, %arg2: memref<1x8x8x64xbf16, #tpu.memory_space<vmem>>, %arg3: memref<1x1x8x64xbf16, #tpu.memory_space<vmem>>, %arg4: memref<64x128xbf16, #tpu.memory_space<vmem>>, %arg5: memref<1x128xf32, #tpu.memory_space<vmem>>, %arg6: memref<3x128x128xbf16, #tpu.memory_space<vmem>>, %arg7: memref<3x128x128xbf16, #tpu.memory_space<vmem>>, %arg8: memref<1x128xf32, #tpu.memory_space<vmem>>, %arg9: memref<1x8x8x128xbf16, #tpu.memory_space<vmem>>, %arg10: memref<1x4x8x128xbf16, #tpu.memory_space<vmem>>) attributes {dimension_semantics = [#tpu.dimension_semantics<parallel>, #tpu.dimension_semantics<parallel>], iteration_bounds = array<i64: 2, 2>, scalar_prefetch = 0 : i64, scratch_operands = 0 : i64, tpu.core_type = #tpu.core_type<tc>, window_params = [{transform_indices = @transform_0, window_bounds = array<i64: 1, 8, 8, 64>}, {transform_indices = @transform_1, window_bounds = array<i64: 1, 1, 8, 64>}, {pipeline_mode = #tpu.pipeline_mode<synchronous>, transform_indices = @transform_2, window_bounds = array<i64: 64, 128>}, {pipeline_mode = #tpu.pipeline_mode<synchronous>, transform_indices = @transform_3, window_bounds = array<i64: 1, 128>}, {pipeline_mode = #tpu.pipeline_mode<synchronous>, transform_indices = @transform_4, window_bounds = array<i64: 3, 128, 128>}, {pipeline_mode = #tpu.pipeline_mode<synchronous>, transform_indices = @transform_5, window_bounds = array<i64: 3, 128, 128>}, {pipeline_mode = #tpu.pipeline_mode<synchronous>, transform_indices = @transform_6, window_bounds = array<i64: 1, 128>}, {transform_indices = @transform_7, window_bounds = array<i64: 1, 8, 8, 128>}, {transform_indices = @transform_8, window_bounds = array<i64: 1, 4, 8, 128>}]} {
    %c0 = arith.constant 0 : index
    %c0_0 = arith.constant 0 : index
    %c0_1 = arith.constant 0 : index
    %c0_2 = arith.constant 0 : index
    %0 = vector.load %arg2[%c0, %c0_0, %c0_1, %c0_2] : memref<1x8x8x64xbf16, #tpu.memory_space<vmem>>, vector<1x8x8x64xbf16>
    %1 = vector.shape_cast %0 : vector<1x8x8x64xbf16> to vector<64x64xbf16>
    %c0_3 = arith.constant 0 : index
    %c0_4 = arith.constant 0 : index
    %2 = vector.load %arg4[%c0_3, %c0_4] : memref<64x128xbf16, #tpu.memory_space<vmem>>, vector<64x128xbf16>
    %cst = arith.constant dense<0.000000e+00> : vector<64x128xf32>
    %3 = tpu.matmul %1, %2, %cst {dimension_numbers = #tpu.dot_dimension_numbers<[1], [0], [0], [1], [0, 0, 1, 1], [], []>} : vector<64x64xbf16>, vector<64x128xbf16>, vector<64x128xf32> -> vector<64x128xf32>
    %c0_5 = arith.constant 0 : index
    %c0_6 = arith.constant 0 : index
    %4 = vector.load %arg5[%c0_5, %c0_6] : memref<1x128xf32, #tpu.memory_space<vmem>>, vector<1x128xf32>
    %5 = vector.broadcast %4 : vector<1x128xf32> to vector<64x128xf32>
    %6 = arith.addf %3, %5 : vector<64x128xf32>
    %cst_7 = arith.constant 0.000000e+00 : f32
    %7 = vector.broadcast %cst_7 : f32 to vector<64x128xf32>
    %8 = arith.maximumf %6, %7 : vector<64x128xf32>
    %9 = arith.truncf %8 : vector<64x128xf32> to vector<64x128xbf16>
    %10 = vector.shape_cast %9 : vector<64x128xbf16> to vector<1x8x8x128xbf16>
    %c0_8 = arith.constant 0 : index
    %c0_9 = arith.constant 0 : index
    %c0_10 = arith.constant 0 : index
    %c0_11 = arith.constant 0 : index
    %11 = vector.load %arg9[%c0_8, %c0_9, %c0_10, %c0_11] : memref<1x8x8x128xbf16, #tpu.memory_space<vmem>>, vector<1x8x8x128xbf16>
    tpu.vector_store %arg9[%c0_8, %c0_9, %c0_10, %c0_11], %10 {strides = array<i32>} : memref<1x8x8x128xbf16, #tpu.memory_space<vmem>>, vector<1x8x8x128xbf16>,
    %c0_12 = arith.constant 0 : index
    %c0_13 = arith.constant 0 : index
    %c0_14 = arith.constant 0 : index
    %c0_15 = arith.constant 0 : index
    %12 = vector.load %arg3[%c0_12, %c0_13, %c0_14, %c0_15] : memref<1x1x8x64xbf16, #tpu.memory_space<vmem>>, vector<1x1x8x64xbf16>
    %13 = vector.shape_cast %12 : vector<1x1x8x64xbf16> to vector<8x64xbf16>
    %c0_16 = arith.constant 0 : index
    %c0_17 = arith.constant 0 : index
    %14 = vector.load %arg4[%c0_16, %c0_17] : memref<64x128xbf16, #tpu.memory_space<vmem>>, vector<64x128xbf16>
    %cst_18 = arith.constant dense<0.000000e+00> : vector<8x128xf32>
    %15 = tpu.matmul %13, %14, %cst_18 {dimension_numbers = #tpu.dot_dimension_numbers<[1], [0], [0], [1], [0, 0, 1, 1], [], []>} : vector<8x64xbf16>, vector<64x128xbf16>, vector<8x128xf32> -> vector<8x128xf32>
    %c0_19 = arith.constant 0 : index
    %c0_20 = arith.constant 0 : index
    %16 = vector.load %arg5[%c0_19, %c0_20] : memref<1x128xf32, #tpu.memory_space<vmem>>, vector<1x128xf32>
    %17 = vector.broadcast %16 : vector<1x128xf32> to vector<8x128xf32>
    %18 = arith.addf %15, %17 : vector<8x128xf32>
    %cst_21 = arith.constant 0.000000e+00 : f32
    %19 = vector.broadcast %cst_21 : f32 to vector<8x128xf32>
    %20 = arith.maximumf %18, %19 : vector<8x128xf32>
    %c0_i32 = arith.constant 0 : i32
    %21 = arith.cmpi sgt, %arg1, %c0_i32 : i32
    %22 = arith.extui %21 : i1 to i32
    %23 = arith.sitofp %22 : i32 to f32
    %24 = vector.broadcast %23 : f32 to vector<8x128xf32>
    %25 = arith.mulf %20, %24 : vector<8x128xf32>
    %26 = vector.shape_cast %8 : vector<64x128xf32> to vector<8x8x128xf32>
    %cst_22 = arith.constant 0.000000e+00 : f32
    %27 = vector.broadcast %cst_22 : f32 to vector<8x1x128xf32>
    %28 = vector.extract_strided_slice %26 {offsets = [0, 0, 0], sizes = [8, 7, 128], strides = [1, 1, 1]} : vector<8x8x128xf32> to vector<8x7x128xf32>
    %29 = tpu.concatenate %27, %28 in 1 : vector<8x1x128xf32>, vector<8x7x128xf32> -> vector<8x8x128xf32>
    %cst_23 = arith.constant 0.000000e+00 : f32
    %30 = vector.broadcast %cst_23 : f32 to vector<1x128xf32>
    %31 = vector.extract_strided_slice %25 {offsets = [0, 0], sizes = [7, 128], strides = [1, 1]} : vector<8x128xf32> to vector<7x128xf32>
    %32 = tpu.concatenate %30, %31 in 0 : vector<1x128xf32>, vector<7x128xf32> -> vector<8x128xf32>
    %33 = vector.shape_cast %26 : vector<8x8x128xf32> to vector<4x2x8x128xf32>
    %34 = vector.shape_cast %29 : vector<8x8x128xf32> to vector<4x2x8x128xf32>
    %35 = vector.extract_strided_slice %33 {offsets = [0, 0, 0, 0], sizes = [4, 1, 8, 128], strides = [1, 1, 1, 1]} : vector<4x2x8x128xf32> to vector<4x1x8x128xf32>
    %36 = vector.shape_cast %35 : vector<4x1x8x128xf32> to vector<4x8x128xf32>
    %37 = vector.extract_strided_slice %33 {offsets = [0, 1, 0, 0], sizes = [4, 1, 8, 128], strides = [1, 1, 1, 1]} : vector<4x2x8x128xf32> to vector<4x1x8x128xf32>
    %38 = vector.shape_cast %37 : vector<4x1x8x128xf32> to vector<4x8x128xf32>
    %39 = vector.extract_strided_slice %34 {offsets = [0, 0, 0, 0], sizes = [4, 1, 8, 128], strides = [1, 1, 1, 1]} : vector<4x2x8x128xf32> to vector<4x1x8x128xf32>
    %40 = vector.shape_cast %39 : vector<4x1x8x128xf32> to vector<4x8x128xf32>
    %41 = vector.extract_strided_slice %34 {offsets = [0, 1, 0, 0], sizes = [4, 1, 8, 128], strides = [1, 1, 1, 1]} : vector<4x2x8x128xf32> to vector<4x1x8x128xf32>
    %42 = vector.shape_cast %41 : vector<4x1x8x128xf32> to vector<4x8x128xf32>
    %43 = vector.shape_cast %25 : vector<8x128xf32> to vector<1x8x128xf32>
    %44 = vector.extract_strided_slice %38 {offsets = [0, 0, 0], sizes = [3, 8, 128], strides = [1, 1, 1]} : vector<4x8x128xf32> to vector<3x8x128xf32>
    %45 = tpu.concatenate %43, %44 in 0 : vector<1x8x128xf32>, vector<3x8x128xf32> -> vector<4x8x128xf32>
    %46 = vector.shape_cast %32 : vector<8x128xf32> to vector<1x8x128xf32>
    %47 = vector.extract_strided_slice %42 {offsets = [0, 0, 0], sizes = [3, 8, 128], strides = [1, 1, 1]} : vector<4x8x128xf32> to vector<3x8x128xf32>
    %48 = tpu.concatenate %46, %47 in 0 : vector<1x8x128xf32>, vector<3x8x128xf32> -> vector<4x8x128xf32>
    %c0_24 = arith.constant 0 : index
    %c0_25 = arith.constant 0 : index
    %c0_26 = arith.constant 0 : index
    %49 = vector.load %arg6[%c0_24, %c0_25, %c0_26] : memref<3x128x128xbf16, #tpu.memory_space<vmem>>, vector<1x128x128xbf16>
    %50 = vector.shape_cast %49 : vector<1x128x128xbf16> to vector<128x128xbf16>
    %51 = arith.truncf %45 : vector<4x8x128xf32> to vector<4x8x128xbf16>
    %52 = vector.shape_cast %51 : vector<4x8x128xbf16> to vector<32x128xbf16>
    %cst_27 = arith.constant dense<0.000000e+00> : vector<32x128xf32>
    %53 = tpu.matmul %52, %50, %cst_27 {dimension_numbers = #tpu.dot_dimension_numbers<[1], [0], [0], [1], [0, 0, 1, 1], [], []>} : vector<32x128xbf16>, vector<128x128xbf16>, vector<32x128xf32> -> vector<32x128xf32>
    %c0_28 = arith.constant 0 : index
    %c0_29 = arith.constant 0 : index
    %c0_30 = arith.constant 0 : index
    %54 = vector.load %arg7[%c0_28, %c0_29, %c0_30] : memref<3x128x128xbf16, #tpu.memory_space<vmem>>, vector<1x128x128xbf16>
    %55 = vector.shape_cast %54 : vector<1x128x128xbf16> to vector<128x128xbf16>
    %56 = arith.truncf %48 : vector<4x8x128xf32> to vector<4x8x128xbf16>
    %57 = vector.shape_cast %56 : vector<4x8x128xbf16> to vector<32x128xbf16>
    %cst_31 = arith.constant dense<0.000000e+00> : vector<32x128xf32>
    %58 = tpu.matmul %57, %55, %cst_31 {dimension_numbers = #tpu.dot_dimension_numbers<[1], [0], [0], [1], [0, 0, 1, 1], [], []>} : vector<32x128xbf16>, vector<128x128xbf16>, vector<32x128xf32> -> vector<32x128xf32>
    %59 = arith.addf %53, %58 : vector<32x128xf32>
    %c1 = arith.constant 1 : index
    %c0_32 = arith.constant 0 : index
    %c0_33 = arith.constant 0 : index
    %60 = vector.load %arg6[%c1, %c0_32, %c0_33] : memref<3x128x128xbf16, #tpu.memory_space<vmem>>, vector<1x128x128xbf16>
    %61 = vector.shape_cast %60 : vector<1x128x128xbf16> to vector<128x128xbf16>
    %62 = arith.truncf %36 : vector<4x8x128xf32> to vector<4x8x128xbf16>
    %63 = vector.shape_cast %62 : vector<4x8x128xbf16> to vector<32x128xbf16>
    %cst_34 = arith.constant dense<0.000000e+00> : vector<32x128xf32>
    %64 = tpu.matmul %63, %61, %cst_34 {dimension_numbers = #tpu.dot_dimension_numbers<[1], [0], [0], [1], [0, 0, 1, 1], [], []>} : vector<32x128xbf16>, vector<128x128xbf16>, vector<32x128xf32> -> vector<32x128xf32>
    %65 = arith.addf %59, %64 : vector<32x128xf32>
    %c1_35 = arith.constant 1 : index
    %c0_36 = arith.constant 0 : index
    %c0_37 = arith.constant 0 : index
    %66 = vector.load %arg7[%c1_35, %c0_36, %c0_37] : memref<3x128x128xbf16, #tpu.memory_space<vmem>>, vector<1x128x128xbf16>
    %67 = vector.shape_cast %66 : vector<1x128x128xbf16> to vector<128x128xbf16>
    %68 = arith.truncf %40 : vector<4x8x128xf32> to vector<4x8x128xbf16>
    %69 = vector.shape_cast %68 : vector<4x8x128xbf16> to vector<32x128xbf16>
    %cst_38 = arith.constant dense<0.000000e+00> : vector<32x128xf32>
    %70 = tpu.matmul %69, %67, %cst_38 {dimension_numbers = #tpu.dot_dimension_numbers<[1], [0], [0], [1], [0, 0, 1, 1], [], []>} : vector<32x128xbf16>, vector<128x128xbf16>, vector<32x128xf32> -> vector<32x128xf32>
    %71 = arith.addf %65, %70 : vector<32x128xf32>
    %c2 = arith.constant 2 : index
    %c0_39 = arith.constant 0 : index
    %c0_40 = arith.constant 0 : index
    %72 = vector.load %arg6[%c2, %c0_39, %c0_40] : memref<3x128x128xbf16, #tpu.memory_space<vmem>>, vector<1x128x128xbf16>
    %73 = vector.shape_cast %72 : vector<1x128x128xbf16> to vector<128x128xbf16>
    %74 = arith.truncf %38 : vector<4x8x128xf32> to vector<4x8x128xbf16>
    %75 = vector.shape_cast %74 : vector<4x8x128xbf16> to vector<32x128xbf16>
    %cst_41 = arith.constant dense<0.000000e+00> : vector<32x128xf32>
    %76 = tpu.matmul %75, %73, %cst_41 {dimension_numbers = #tpu.dot_dimension_numbers<[1], [0], [0], [1], [0, 0, 1, 1], [], []>} : vector<32x128xbf16>, vector<128x128xbf16>, vector<32x128xf32> -> vector<32x128xf32>
    %77 = arith.addf %71, %76 : vector<32x128xf32>
    %c2_42 = arith.constant 2 : index
    %c0_43 = arith.constant 0 : index
    %c0_44 = arith.constant 0 : index
    %78 = vector.load %arg7[%c2_42, %c0_43, %c0_44] : memref<3x128x128xbf16, #tpu.memory_space<vmem>>, vector<1x128x128xbf16>
    %79 = vector.shape_cast %78 : vector<1x128x128xbf16> to vector<128x128xbf16>
    %80 = arith.truncf %42 : vector<4x8x128xf32> to vector<4x8x128xbf16>
    %81 = vector.shape_cast %80 : vector<4x8x128xbf16> to vector<32x128xbf16>
    %cst_45 = arith.constant dense<0.000000e+00> : vector<32x128xf32>
    %82 = tpu.matmul %81, %79, %cst_45 {dimension_numbers = #tpu.dot_dimension_numbers<[1], [0], [0], [1], [0, 0, 1, 1], [], []>} : vector<32x128xbf16>, vector<128x128xbf16>, vector<32x128xf32> -> vector<32x128xf32>
    %83 = arith.addf %77, %82 : vector<32x128xf32>
    %c0_46 = arith.constant 0 : index
    %c0_47 = arith.constant 0 : index
    %84 = vector.load %arg8[%c0_46, %c0_47] : memref<1x128xf32, #tpu.memory_space<vmem>>, vector<1x128xf32>
    %85 = vector.broadcast %84 : vector<1x128xf32> to vector<32x128xf32>
    %86 = arith.addf %83, %85 : vector<32x128xf32>
    %cst_48 = arith.constant 0.000000e+00 : f32
    %87 = vector.broadcast %cst_48 : f32 to vector<32x128xf32>
    %88 = arith.maximumf %86, %87 : vector<32x128xf32>
    %89 = arith.truncf %88 : vector<32x128xf32> to vector<32x128xbf16>
    %90 = vector.shape_cast %89 : vector<32x128xbf16> to vector<1x4x8x128xbf16>
    %c0_49 = arith.constant 0 : index
    %c0_50 = arith.constant 0 : index
    %c0_51 = arith.constant 0 : index
    %c0_52 = arith.constant 0 : index
    %91 = vector.load %arg10[%c0_49, %c0_50, %c0_51, %c0_52] : memref<1x4x8x128xbf16, #tpu.memory_space<vmem>>, vector<1x4x8x128xbf16>
    tpu.vector_store %arg10[%c0_49, %c0_50, %c0_51, %c0_52], %90 {strides = array<i32>} : memref<1x4x8x128xbf16, #tpu.memory_space<vmem>>, vector<1x4x8x128xbf16>,
    return
  }
  func.func @transform_0(%arg0: i32, %arg1: i32) -> (i32, i32, i32, i32) {
    %c0_i32 = arith.constant 0 : i32
    %c0_i32_0 = arith.constant 0 : i32
    %c0_i32_1 = arith.constant 0 : i32
    return %arg0, %arg1, %c0_i32, %c0_i32_0 : i32, i32, i32, i32
  }
  func.func @transform_1(%arg0: i32, %arg1: i32) -> (i32, i32, i32, i32) {
    %c0_i32 = arith.constant 0 : i32
    %c0_i32_0 = arith.constant 0 : i32
    %c0_i32_1 = arith.constant 0 : i32
    return %arg0, %arg1, %c0_i32, %c0_i32_0 : i32, i32, i32, i32
  }
  func.func @transform_2(%arg0: i32, %arg1: i32) -> (i32, i32) {
    %c0_i32 = arith.constant 0 : i32
    %c0_i32_0 = arith.constant 0 : i32
    %c0_i32_1 = arith.constant 0 : i32
    return %c0_i32, %c0_i32_0 : i32, i32
  }
  func.func @transform_3(%arg0: i32, %arg1: i32) -> (i32, i32) {
    %c0_i32 = arith.constant 0 : i32
    %c0_i32_0 = arith.constant 0 : i32
    %c0_i32_1 = arith.constant 0 : i32
    return %c0_i32, %c0_i32_0 : i32, i32
  }
  func.func @transform_4(%arg0: i32, %arg1: i32) -> (i32, i32, i32) {
    %c0_i32 = arith.constant 0 : i32
    %c0_i32_0 = arith.constant 0 : i32
    %c0_i32_1 = arith.constant 0 : i32
    %c0_i32_2 = arith.constant 0 : i32
    return %c0_i32, %c0_i32_0, %c0_i32_1 : i32, i32, i32
  }
  func.func @transform_5(%arg0: i32, %arg1: i32) -> (i32, i32, i32) {
    %c0_i32 = arith.constant 0 : i32
    %c0_i32_0 = arith.constant 0 : i32
    %c0_i32_1 = arith.constant 0 : i32
    %c0_i32_2 = arith.constant 0 : i32
    return %c0_i32, %c0_i32_0, %c0_i32_1 : i32, i32, i32
  }
  func.func @transform_6(%arg0: i32, %arg1: i32) -> (i32, i32) {
    %c0_i32 = arith.constant 0 : i32
    %c0_i32_0 = arith.constant 0 : i32
    %c0_i32_1 = arith.constant 0 : i32
    return %c0_i32, %c0_i32_0 : i32, i32
  }
  func.func @transform_7(%arg0: i32, %arg1: i32) -> (i32, i32, i32, i32) {
    %c0_i32 = arith.constant 0 : i32
    %c0_i32_0 = arith.constant 0 : i32
    %c0_i32_1 = arith.constant 0 : i32
    return %arg0, %arg1, %c0_i32, %c0_i32_0 : i32, i32, i32, i32
  }
  func.func @transform_8(%arg0: i32, %arg1: i32) -> (i32, i32, i32, i32) {
    %c0_i32 = arith.constant 0 : i32
    %c0_i32_0 = arith.constant 0 : i32
    %c0_i32_1 = arith.constant 0 : i32
    return %arg0, %arg1, %c0_i32, %c0_i32_0 : i32, i32, i32, i32
  }
}

</mosaic_0001>

<bundles_post_ra>
// kernel: nvds_edge_forward.1
= control target key start
LH: loop header
LB: loop body
LE: loop exit
PB: predicated region body
PF: predicated region fallthrough
CT: control target
= control target key end

     0   :  { %s2896_s0 = inlined_call_operand.vmem [shape: bf16[2,16,8,64], index: 0, kind: input, shape index: {}]   ;;  %s2897_s1 = inlined_call_operand.vmem [shape: bf16[2,2,8,64], index: 1, kind: input, shape index: {}]   ;;  %s2898_s2 = inlined_call_operand.vmem [shape: bf16[64,128], index: 2, kind: input, shape index: {}]   ;;  %s2899_s3 = inlined_call_operand.vmem [shape: f32[1,128], index: 3, kind: input, shape index: {}]   ;;  %s2900_s4 = inlined_call_operand.vmem [shape: bf16[3,128,128], index: 4, kind: input, shape index: {}]   ;;  %s2901_s5 = inlined_call_operand.vmem [shape: bf16[3,128,128], index: 5, kind: input, shape index: {}]   ;;  %s2902_s6 = inlined_call_operand.vmem [shape: f32[1,128], index: 6, kind: input, shape index: {}]   ;;  %s2903_s7 = inlined_call_operand.vmem [shape: bf16[2,16,8,128], index: 7, kind: output, shape index: {0}]   ;;  %s2904_s8 = inlined_call_operand.hbm [shape: bf16[2,8,8,128], index: 8, kind: output, shape index: {1}]  }
   0x1   :  { %2909 = sst [smem:[#allocation8_spill]] %s2896_s0 }
   0x2   :  { %14 = vsyncpa [#allocation3], 0 }
   0x3   :  { %16 = vsyncpa [#allocation3 + $0x1], 0  ;;  %s2473_s27 = smov 0   ;;  %s2475_s28 = smov 0  }
   0x4   :  { %s2477_s29 = smov 0   ;;  %s2479_s30 = smov 0  }
   0x5   :  { %s2481_s9 = smov 0   ;;  %s2483_s10 = smov 0  }
   0x6   :  { %s2485_s11 = smov 0   ;;  %s2487_s12 = smov 0  }
   0x7 LB: > { %2910 = sst [smem:[#allocation5_spill]] %s2417_s11  ;;  %s1687_s13 = sadd.s32 4294967295, %s2421_s12   ;;  %s2421_s12 = sphi %s2487_s12, %s22_s12   ;;  %s2417_s11 = sphi %s2485_s11, %s2921_s11   ;;  %s2413_s10 = sphi %s2483_s10, %s2926_s10   ;;  %s2409_s9 = sphi %s2481_s9, %s2919_s9   ;;  %s2405_s30 = sphi %s2479_s30, %s2925_s30   ;;  %s2401_s29 = sphi %s2477_s29, %s2924_s29   ;;  %s2397_s28 = sphi %s2475_s28, %s2923_s28   ;;  %s2393_s27 = sphi %s2473_s27, %s2922_s27  }
   0x8   : > { %s1688_s14 = sadd.s32 4294967294, %s2421_s12   ;;  %s31_s15 = sadd.s32 1, %s2413_s10 }
   0x9   : > { %p32_p0 = scmp.ge.s32.totalorder %s31_s15, 2  ;;  %s34_s16 = sadd.s32 1, %s2417_s11 }
   0xa   : > { %p242_p1 = scmp.ne.s32.totalorder %s2401_s29, %s2397_s28  ;;  %p243_p2 = scmp.eq.s32.totalorder %s1687_s13, 3 }
   0xb   : > { %s2928_s15 = smov (%p32_p0, %s31_s15), 0  ;;  %s2930_s16 = smov (!%p32_p0, %s34_s16), %s2417_s11 }
   0xc   : > { %2911 = sst [smem:[#allocation6_spill]] %s2928_s15  ;;  %s228_s17 = ssub.s32 %s2413_s10, %s2928_s15 }
   0xd   : > { %p2524_p3 = por %p243_p2, %p242_p1  ;;  %p36_p4 = scmp.ge.s32.totalorder %s2930_s16, 2 }
   0xe   : > { %p248_p5 = scmp.ne.s32.totalorder %s2397_s28, %s2393_s27  ;;  %p249_p6 = scmp.eq.s32.totalorder %s1688_s14, 3 }
   0xf   : > { %p1691_p7 = scmp.ge.s32.totalorder %s2421_s12, 1  ;;  %s2932_s16 = smov (%p36_p4, %s2930_s16), 0 }
  0x10   : > { %2913 = sst [smem:[#allocation7_spill]] %s2932_s16  ;;  %p2533_p8 = por %p249_p6, %p248_p5 }
  0x11   : > { %p306_p9 = scmp.lt.s32.totalorder %s2421_s12, 5  ;;  %s227_s20 = ssub.s32 %s2417_s11, %s2932_s16 }
  0x12   : > { %s232_s21 = sadd.s32 1, %s2401_s29  ;;  %s229_s22 = sor.u32 %s228_s17, %s227_s20 }
  0x13   : > { %p307_p10 = pnand %p1691_p7, %p306_p9  ;;  %p230_p11 = scmp.eq.s32.totalorder %s229_s22, 0 }
  0x14   : > { %v2267_v0 = vld [vmem:[%s2898_s2] sm:$0xff] (!%p307_p10)   ;;  %v2423_v1 = vmov (!%p307_p10), 0.0   ;;  %s1693_s14 = sshll.u32 (!%p307_p10), %s2405_s30, 3  ;;  %v2269_v3 = vld [vmem:[%s2898_s2 + $0x8] sm:$0xff] (!%p307_p10)   ;;  %p362_p12 = scmp.lt.s32.totalorder (!%p307_p10), %s2409_s9, 1  ;;  %v2271_v5 = vld [vmem:[%s2898_s2 + $0x10] sm:$0xff] (!%p307_p10)  }
  0x15   : > { %s2542_s23 = scalar_select %p230_p11, %s2401_s29, %s232_s21  }
  0x16   : > { %310 = sbr.rel (%p307_p10) target bundleno = 571 (0x23b), region = 48  ;;  %2040 = vmatprep.subr.bf16.mxu1 (!%p307_p10), %v2423_v1  ;;  %v2268_v2 = vld [vmem:[%s2898_s2] sm:$0xff] (!%p307_p10)   ;;  %2024 = vmatprep.subr.bf16.mxu0 (!%p307_p10), %v2267_v0  ;;  %v2270_v4 = vld [vmem:[%s2898_s2 + $0x8] sm:$0xff] (!%p307_p10)   ;;  %p364_p13 = scmp.lt.s32.totalorder (!%p307_p10), %s1693_s14, 15  ;;  %v2272_v6 = vld [vmem:[%s2898_s2 + $0x10] sm:$0xff] (!%p307_p10)   ;;  %vm458_vm0 = vcmask (!%p307_p10), 523264  }
  0x17   : > { %2025 = vmatpush3.bf16.msra.mxu0 (!%p307_p10), %v2267_v0  ;;  %2041 = vmatpush3.bf16.msra.mxu1 (!%p307_p10), %v2268_v2  ;;  %v2273_v7 = vld [vmem:[%s2898_s2 + $0x18] sm:$0xff] (!%p307_p10)   ;;  %p373_p0 = scmp.lt.s32.totalorder (!%p307_p10), %s2405_s30, 1  ;;  %s2915_s0 = sld [smem:[#allocation8_spill]] (!%p307_p10)  ;;  %vm2424_vm1 = vmmov (!%p307_p10), 0   ;;  %v2279_v10 = vld [vmem:[%s2901_s5 + $0x40] sm:$0xff] (!%p307_p10)   ;;  %v2281_v15 = vld [vmem:[%s2901_s5 + $0x48] sm:$0xff] (!%p307_p10)  }
  0x18   : > { %2026 = vmatprep.subr.bf16.mxu0 (!%p307_p10), %v2269_v3  ;;  %2042 = vmatprep.subr.bf16.mxu1 (!%p307_p10), %v2423_v1  ;;  %v2274_v8 = vld [vmem:[%s2898_s2 + $0x18] sm:$0xff] (!%p307_p10)   ;;  %v2280_v11 = vld [vmem:[%s2901_s5] sm:$0xff] (!%p307_p10)   ;;  %v2282_v16 = vld [vmem:[%s2901_s5 + $0x8] sm:$0xff] (!%p307_p10)   ;;  %p668_p1 = scmp.gt.s32.totalorder (!%p307_p10), %s2405_s30, 0  ;;  %vm697_vm2 = vcmask (!%p307_p10), 1040384  }
  0x19   : > { %2048 = vmatprep.mubr.msk.bf16.mxu1 (!%p307_p10), %vm2424_vm1, %v2423_v1  ;;  %v2283_v17 = vld [vmem:[%s2901_s5 + $0x50] sm:$0xff] (!%p307_p10)   ;;  %v2285_v20 = vld [vmem:[%s2901_s5 + $0x58] sm:$0xff] (!%p307_p10)   ;;  %v2287_v22 = vld [vmem:[%s2901_s5 + $0x60] sm:$0xff] (!%p307_p10)  }
  0x1a   : > { %v2284_v19 = vld [vmem:[%s2901_s5 + $0x10] sm:$0xff] (!%p307_p10)   ;;  %v2286_v21 = vld [vmem:[%s2901_s5 + $0x18] sm:$0xff] (!%p307_p10)   ;;  %v2288_v23 = vld [vmem:[%s2901_s5 + $0x20] sm:$0xff] (!%p307_p10)  }
  0x1b   : > { %2027 = vmatpush3.bf16.msra.mxu0 (!%p307_p10), %v2269_v3  ;;  %2043 = vmatpush3.bf16.msra.mxu1 (!%p307_p10), %v2270_v4  ;;  %v2289_v24 = vld [vmem:[%s2901_s5 + $0x68] sm:$0xff] (!%p307_p10)   ;;  %v2291_v26 = vld [vmem:[%s2901_s5 + $0x70] sm:$0xff] (!%p307_p10)   ;;  %v2293_v28 = vld [vmem:[%s2901_s5 + $0x78] sm:$0xff] (!%p307_p10)  }
  0x1c   : > { %2028 = vmatprep.subr.bf16.mxu0 (!%p307_p10), %v2271_v5  ;;  %2044 = vmatprep.subr.bf16.mxu1 (!%p307_p10), %v2423_v1  ;;  %v2290_v25 = vld [vmem:[%s2901_s5 + $0x28] sm:$0xff] (!%p307_p10)   ;;  %v2292_v27 = vld [vmem:[%s2901_s5 + $0x30] sm:$0xff] (!%p307_p10)   ;;  %v2294_v29 = vld [vmem:[%s2901_s5 + $0x38] sm:$0xff] (!%p307_p10)  }
  0x1d   : > { %s363_s26 = scalar_select %p362_p12, %s2409_s9, 1  ;;  %v2646_v30 = vld [vmem:[%s2900_s4 + $0x80] sm:$0xff]   ;;  %vm1873_vm3 = vmneg %vm697_vm2 }
  0x1e   : > { %s2934_s14 = smov (!%p364_p13, %s1693_s14), 15  ;;  %v2652_v31 = vld [vmem:[%s2900_s4] sm:$0xff]   ;;  %vm2679_vm4 = vmpackc.low %vm1873_vm3, %vm1873_vm3 }
  0x1f   : > { %s1694_s13 = sshll.u32 %s363_s26, 4  ;;  %2029 = vmatpush3.bf16.msra.mxu0 %v2271_v5  ;;  %2045 = vmatpush3.bf16.msra.mxu1 %v2272_v6  ;;  %v1701_v32 = vld [vmem:[%s2899_s3] ss:$0 sm:$0xff] }
  0x20   : > { %s2565_s21 = sadd.s32 %s1694_s13, %s2934_s14  ;;  %s1696_s13 = sshll.u32 %s363_s26, 1  ;;  %2030 = vmatprep.subr.bf16.mxu0 %v2273_v7  ;;  %2046 = vmatprep.subr.bf16.mxu1 %v2423_v1 }
  0x21   : > { %s2908_s24 = sshll.u32 %s2565_s21, 2 }
  0x22   : > { %s2580_s14 = scalar_lea.vmem %s2915_s0, %s2908_s24 }
  0x23   : > { %v2275_v9 = vld [vmem:[%s2580_s14] sm:$0xff]   ;;  %s374_s16 = scalar_select %p373_p0, %s2405_s30, 1  ;;  %v2276_v12 = vld [vmem:[%s2580_s14 + $0x8] sm:$0xff]   ;;  %2031 = vmatpush3.bf16.msra.mxu0 %v2273_v7  ;;  %2047 = vmatpush3.bf16.msra.mxu1 %v2274_v8  ;;  %v2277_v14 = vld [vmem:[%s2580_s14 + $0x10] sm:$0xff]  }
  0x24   : > { %2032 = vmatprep.mubr.msk.bf16.mxu0 %vm458_vm0, %v2275_v9  ;;  %2112 = vmatprep.subr.bf16.mxu0 %v2279_v10  ;;  %v2278_v18 = vld [vmem:[%s2580_s14 + $0x18] sm:$0xff]   ;;  %s669_s25 = scalar_select %p668_p1, 1, 0 }
  0x25   : > { %s376_s11 = sadd.s32 %s1696_s13, %s374_s16  ;;  %2052 = vmatprep.subr.bf16.mxu1 %v2280_v11  ;;  %s2916_s14 = sshll.u32 %s2565_s21, 2 }
  0x26   : > { %s1697_s26 = sshll.u32 %s376_s11, 2  ;;  %2033 = vmatmul.mubr.msk.bf16.vlgmr.msra.gmra.mrb[0].mxu0 %vm458_vm0, %v2276_v12  ;;  %s670_s13 = scvt.s32.f32 %s669_s25 }
  0x27   : > { %s378_s0 = scalar_lea.vmem %s2897_s1, %s1697_s26  ;;  %2036 = vmatprep.mubr.msk.bf16.mxu0 %vm458_vm0, %v2277_v14  ;;  %2113 = vmatpush3.bf16.msra.mxu0 %v2279_v10  ;;  %s2672_s15 = scalar_lea.vmem %s2903_s7, %s2916_s14 }
  0x28   : > { %v584_v13 = vld [vmem:[%s378_s0] sm:$0xf]  ;;  %2114 = vmatprep.subr.bf16.mxu0 %v2281_v15  ;;  %v671_v40 = vstv %s670_s13  ;;  %s358_s13 = sand.u32 1, %s2397_s28   ;;  %s1859_s21 = sshll.u32 %s2409_s9, 3 }
  0x29   : > { %2049 = vmatmul.mubr.msk.bf16.vlgmr.msra.gmra.mrb[0].mxu1 %vm458_vm0, %v584_v13  ;;  %s1692_s14 = sshll.u32 %s358_s13, 4  ;;  %s2844_s26 = scalar_lea.sflag [#allocation3], %s358_s13 }
  0x2a   : > { %2053 = vmatpush3.bf16.msra.mxu1 %v2280_v11  ;;  %s360_s0 = scalar_lea.vmem [#allocation2], %s1692_s14  ;;  %s2425_s14 = smov [#allocation2]  }
  0x2b   : > { %2054 = vmatprep.subr.bf16.mxu1 %v2282_v16  ;;  %2115 = vmatpush3.bf16.msra.mxu0 %v2281_v15  ;;  %s1550_s11 = sshll.u32 %s360_s0, 4  ;;  %s2331_s16 = sshll.u32 %s2425_s14, 4  ;;  %s2840_s11 = int_to_ptr.vmem [resolvable:$true] %s1550_s11  ;;  %s2332_s16 = int_to_ptr.vmem [resolvable:$false] %s2331_s16 }
  0x2c   : > { %2116 = vmatprep.subr.bf16.mxu0 %v2283_v17  ;;  %s2327_s17 = scalar_lea.vmem %s2840_s11, 256  ;;  %s2333_s20 = scalar_lea.vmem %s2332_s16, 512 }
  0x2d   : > { %p2328_p2 = scmp.ne.s32.totalorder %s2840_s11, %s2327_s17  ;;  %p2334_p6 = scmp.lt.s32.totalorder %s2840_s11, %s2332_s16 }
  0x2e   : > { %2055 = vmatpush3.bf16.msra.mxu1 %v2282_v16  ;;  %2037 = vmatmul.mubr.msk.bf16.gmra.mrb[4].mxu0 %vm458_vm0, %v2278_v18  ;;  %p2335_p7 = scmp.lt.s32.totalorder %s2333_s20, %s2327_s17 }
  0x2f   : > { %2056 = vmatprep.subr.bf16.mxu1 %v2284_v19  ;;  %2117 = vmatpush3.bf16.msra.mxu0 %v2283_v17  ;;  %p2329_p4 = pnand %p2328_p2, %p2524_p3 }
  0x30   : > { %2118 = vmatprep.subr.bf16.mxu0 %v2285_v20  ;;  %p2336_p9 = por %p2335_p7, %p2334_p6 }
  0x31   : > { %p2330_p5 = pneg %p2329_p4 }
  0x32   : > { %2057 = vmatpush3.bf16.msra.mxu1 %v2284_v19 }
  0x33   : > { %2058 = vmatprep.subr.bf16.mxu1 %v2286_v21  ;;  %2119 = vmatpush3.bf16.msra.mxu0 %v2285_v20  ;;  %p2337_p10 = pnand %p2336_p9, %p2330_p5 }
  0x34   : > { %2120 = vmatprep.subr.bf16.mxu0 %v2287_v22 }
  0x36   : > { %2059 = vmatpush3.bf16.msra.mxu1 %v2286_v21 }
  0x37   : > { %2121 = vmatpush3.bf16.msra.mxu0 %v2287_v22  ;;  %2060 = vmatprep.subr.bf16.mxu1 %v2288_v23 }
  0x38   : > { %2122 = vmatprep.subr.bf16.mxu0 %v2289_v24 }
  0x3a   : > { %2061 = vmatpush3.bf16.msra.mxu1 %v2288_v23  ;;  %v2297_v23 = vld [vmem:[%s2900_s4 + $0x88] sm:$0xff]  }
  0x3b   : > { %2123 = vmatpush3.bf16.msra.mxu0 %v2289_v24  ;;  %2062 = vmatprep.subr.bf16.mxu1 %v2290_v25 }
  0x3c   : > { %2124 = vmatprep.subr.bf16.mxu0 %v2291_v26 }
  0x3e   : > { %2063 = vmatpush3.bf16.msra.mxu1 %v2290_v25 }
  0x3f   : > { %2125 = vmatpush3.bf16.msra.mxu0 %v2291_v26  ;;  %2064 = vmatprep.subr.bf16.mxu1 %v2292_v27 }
  0x40   : > { %2126 = vmatprep.subr.bf16.mxu0 %v2293_v28 }
  0x42   : > { %2065 = vmatpush3.bf16.msra.mxu1 %v2292_v27 }
  0x43   : > { %2127 = vmatpush3.bf16.msra.mxu0 %v2293_v28  ;;  %2066 = vmatprep.subr.bf16.mxu1 %v2294_v29  ;;  %v2298_v28 = vld [vmem:[%s2900_s4 + $0x8] sm:$0xff]  }
  0x44   : > { %2132 = vmatprep.subr.bf16.mxu0 %v2646_v30 }
  0x46   : > { %2067 = vmatpush3.bf16.msra.mxu1 %v2294_v29  ;;  %v2299_v29 = vld [vmem:[%s2900_s4 + $0x90] sm:$0xff]  }
  0x47   : > { %2072 = vmatprep.subr.bf16.mxu1 %v2652_v31 }
  0xf9   : > { %v2034_v33 = vpop.f32.mrb[0].mxu0 }
  0xfa   : > { %v514_v35 = vadd.f32 %v2034_v33, %v1701_v32  ;;  %v505_v36 = vpop.f32.mrb[1].mxu0  ;;  %v2302_v33 = vld [vmem:[%s2900_s4 + $0x18] sm:$0xff]  }
  0xfb   : > { %v506_v39 = vadd.f32 %v1701_v32, %v505_v36  ;;  %v2035_v41 = vpop.f32.mrb[2].mxu0  ;;  %v2306_v36 = vld [vmem:[%s2900_s4 + $0x28] sm:$0xff]  }
  0xfc   : > { %v661_v34 = vpop.f32.mrb[0].mxu1  ;;  %v2659_v43 = vmax.f32 %v514_v35, 0.0  ;;  %v517_v45 = vadd.f32 %v2035_v41, %v1701_v32  ;;  %v508_v46 = vpop.f32.mrb[3].mxu0  ;;  %v2305_v35 = vld [vmem:[%s2900_s4 + $0xa8] sm:$0xff]   ;;  %v2311_v41 = vld [vmem:[%s2901_s5 + $0x80] sm:$0xff]  }
  0xfd   : > { %v662_v37 = vadd.f32 %v1701_v32, %v661_v34  ;;  %v2050_v38 = vpop.f32.mrb[1].mxu1  ;;  %v2661_v48 = vmax.f32 %v506_v39, 0.0  ;;  %v509_v49 = vadd.f32 %v1701_v32, %v508_v46  ;;  %v2304_v34 = vld [vmem:[%s2900_s4 + $0x20] sm:$0xff]   ;;  %v2309_v39 = vld [vmem:[%s2900_s4 + $0xb8] sm:$0xff]   ;;  %v2315_v46 = vld [vmem:[%s2901_s5 + $0x90] sm:$0xff]  }
  0xfe   : > { %v664_v42 = vpop.f32.mrb[2].mxu1  ;;  %v683_v50 = vrot.slane %v2659_v43, 7  ;;  %v2664_v52 = vmax.f32 %v517_v45, 0.0  ;;  %v2308_v38 = vld [vmem:[%s2900_s4 + $0x30] sm:$0xff]   ;;  %v2314_v45 = vld [vmem:[%s2900_s4 + $0x48] sm:$0xff]  }
  0xff   : > { %v667_v44 = vmax.f32 %v662_v37, 0.0  ;;  %v2051_v47 = vpop.f32.mrb[3].mxu1  ;;  %v681_v53 = vrot.slane %v2661_v48, 7  ;;  %v537_v54 = vmax.f32 %v509_v49, 0.0  ;;  %v1885_v55 = vpack.c.bf16 %v2659_v43, %v2661_v48  ;;  %v2307_v37 = vld [vmem:[%s2900_s4 + $0xb0] sm:$0xff]   ;;  %v2312_v42 = vld [vmem:[%s2900_s4 + $0x40] sm:$0xff]  }
 0x100   : > { %v1925_v57 = vpack.c.bf16 %v2664_v52, %v2659_v43  ;;  %v684_v58 = vrot.slane %v2664_v52, 7  ;;  %v2316_v47 = vld [vmem:[%s2900_s4 + $0x50] sm:$0xff]   ;;  %v2317_v49 = vld [vmem:[%s2901_s5 + $0x98] sm:$0xff]   ;;  %v2319_v43 = vld [vmem:[%s2901_s5 + $0xa0] sm:$0xff]  }
 0x101   : > { %v672_v51 = vmul.f32 %v671_v40, %v667_v44  ;;  %v1920_v60 = vpack.c.bf16 %v537_v54, %v2661_v48  ;;  %v682_v61 = vrot.slane %v537_v54, 7  ;;  %v2038_v62 = vpop.f32.mrb[4].mxu0  ;;  %v1892_v63 = vpack.c.bf16 %v683_v50, %v681_v53  ;;  %v2310_v40 = vld [vmem:[%s2900_s4 + $0x38] sm:$0xff]   ;;  %v2313_v44 = vld [vmem:[%s2901_s5 + $0x88] sm:$0xff]   ;;  %v2320_v48 = vld [vmem:[%s2900_s4 + $0x60] sm:$0xff]  }
 0x102   : > { %v1899_v0 = vpack.c.bf16 %v2664_v52, %v537_v54  ;;  %1947 = vst [vmem:[%s2672_s15 + $0x8] sm:$0xff] %v1925_v57   ;;  %v530_v1 = vadd.f32 %v2038_v62, %v1701_v32  ;;  %v521_v2 = vpop.f32.mrb[5].mxu0  ;;  %v2318_v50 = vld [vmem:[%s2900_s4 + $0x58] sm:$0xff]   ;;  %v2323_v53 = vld [vmem:[%s2901_s5 + $0xb0] sm:$0xff]  }
 0x103   : > { %v707_v56 = vrot.slane %v672_v51, 7  ;;  %v1883_v3 = vpack.c.bf16 %v537_v54, %v672_v51  ;;  %1921 = vst [vmem:[%s2672_s15] sm:$0xff] %v1920_v60   ;;  %v522_v4 = vadd.f32 %v1701_v32, %v521_v2  ;;  %v2039_v5 = vpop.f32.mrb[6].mxu0  ;;  %2128 = vmatprep.mubr.msk.bf16.mxu0 %vm2679_vm4, %v1892_v63  ;;  %v2689_v7 = vpack.c.bf16 %v684_v58, %v682_v61  ;;  %v2321_v51 = vld [vmem:[%s2901_s5 + $0xa8] sm:$0xff]   ;;  %v2324_v54 = vld [vmem:[%s2900_s4 + $0x70] sm:$0xff]  }
 0x104   : > { %v2691_v8 = vmax.f32 %v530_v1, 0.0  ;;  %v533_v9 = vadd.f32 %v2039_v5, %v1701_v32  ;;  %v524_v10 = vpop.f32.mrb[7].mxu0 }
 0x105   : > { %v1876_v6 = vpack.c.bf16 %v682_v61, %v707_v56  ;;  %v2693_v11 = vmax.f32 %v522_v4, 0.0  ;;  %v525_v12 = vadd.f32 %v1701_v32, %v524_v10  ;;  %v2300_v32 = vld [vmem:[%s2900_s4 + $0x10] sm:$0xff]   ;;  %v2326_v56 = vld [vmem:[%s2900_s4 + $0x78] sm:$0xff]   ;;  %v1852_v61 = vld [vmem:[%s2902_s6] ss:$0 sm:$0xff] }
 0x106   : > { %v687_v13 = vrot.slane %v2691_v8, 7  ;;  %v2698_v14 = vmax.f32 %v533_v9, 0.0 }
 0x107   : > { %2068 = vmatprep.mubr.msk.bf16.mxu1 %vm2679_vm4, %v1876_v6  ;;  %v685_v15 = vrot.slane %v2693_v11, 7  ;;  %v1886_v16 = vpack.c.bf16 %v2691_v8, %v2693_v11  ;;  %v2703_v17 = vmax.f32 %v525_v12, 0.0 }
 0x108   : > { %v1935_v18 = vpack.c.bf16 %v2698_v14, %v2691_v8  ;;  %v688_v19 = vrot.slane %v2698_v14, 7 }
 0x109   : > { %v1897_v20 = vpack.c.bf16 %v687_v13, %v685_v15  ;;  %v1930_v21 = vpack.c.bf16 %v2703_v17, %v2693_v11  ;;  %v686_v22 = vrot.slane %v2703_v17, 7  ;;  %v1900_v24 = vpack.c.bf16 %v2698_v14, %v2703_v17 }
 0x10a   : > { %1949 = vst [vmem:[%s2672_s15 + $0x18] sm:$0xff] %v1935_v18   ;;  %v1884_v25 = vpack.c.bf16 %v2703_v17, %v2664_v52  ;;  %v2322_v52 = vld [vmem:[%s2900_s4 + $0x68] sm:$0xff]  }
 0x10b   : > { %1948 = vst [vmem:[%s2672_s15 + $0x10] sm:$0xff] %v1930_v21   ;;  %v1881_v26 = vpack.c.bf16 %v686_v22, %v684_v58  ;;  %v2720_v27 = vpack.c.bf16 %v688_v19, %v686_v22  ;;  %2129 = vmatmul.mubr.msk.bf16.vlgmr.msra.gmra.mrb[8].mxu0 %vm2679_vm4, %v1897_v20  ;;  %s1858_s15 = sshll.u32 %s2405_s30, 2 }
 0x10c   : > { %2133 = vmatpush3.bf16.msra.mxu0 %v2646_v30  ;;  %2148 = vmatprep.mubr.bf16.mxu0 %v1899_v0  ;;  %v2301_v30 = vld [vmem:[%s2900_s4 + $0x98] sm:$0xff]   ;;  %s1547_s24 = sadd.s32 %s1859_s21, %s1858_s15 }
 0x10d   : > { %2069 = vmatmul.mubr.msk.bf16.vlgmr.msra.gmra.mrb[4].mxu1 %vm2679_vm4, %v1881_v26  ;;  %2134 = vmatprep.subr.bf16.mxu0 %v2297_v23  ;;  %s1860_s22 = sshll.u32 %s1547_s24, 6 }
 0x10e   : > { %2073 = vmatpush3.bf16.msra.mxu1 %v2652_v31  ;;  %2088 = vmatprep.mubr.bf16.mxu1 %v1883_v3  ;;  %v2303_v31 = vld [vmem:[%s2900_s4 + $0xa0] sm:$0xff]   ;;  %s2838_s25 = scalar_lea.hbm %s2904_s8, %s1860_s22 }
 0x10f   : > { %2074 = vmatprep.subr.bf16.mxu1 %v2298_v28 }
 0x110   : > { %2135 = vmatpush3.bf16.msra.mxu0 %v2297_v23 }
 0x111   : > { %2136 = vmatprep.subr.bf16.mxu0 %v2299_v29 }
 0x112   : > { %2075 = vmatpush3.bf16.msra.mxu1 %v2298_v28 }
 0x113   : > { %2076 = vmatprep.subr.bf16.mxu1 %v2300_v32 }
 0x114   : > { %2137 = vmatpush3.bf16.msra.mxu0 %v2299_v29 }
 0x115   : > { %2138 = vmatprep.subr.bf16.mxu0 %v2301_v30 }
 0x116   : > { %2077 = vmatpush3.bf16.msra.mxu1 %v2300_v32 }
 0x117   : > { %2078 = vmatprep.subr.bf16.mxu1 %v2302_v33 }
 0x118   : > { %2139 = vmatpush3.bf16.msra.mxu0 %v2301_v30 }
 0x119   : > { %2140 = vmatprep.subr.bf16.mxu0 %v2303_v31 }
 0x11a   : > { %2079 = vmatpush3.bf16.msra.mxu1 %v2302_v33 }
 0x11b   : > { %2080 = vmatprep.subr.bf16.mxu1 %v2304_v34 }
 0x11c   : > { %2141 = vmatpush3.bf16.msra.mxu0 %v2303_v31 }
 0x11d   : > { %2142 = vmatprep.subr.bf16.mxu0 %v2305_v35 }
 0x11e   : > { %2081 = vmatpush3.bf16.msra.mxu1 %v2304_v34 }
 0x11f   : > { %2082 = vmatprep.subr.bf16.mxu1 %v2306_v36 }
 0x120   : > { %2143 = vmatpush3.bf16.msra.mxu0 %v2305_v35 }
 0x121   : > { %2144 = vmatprep.subr.bf16.mxu0 %v2307_v37 }
 0x122   : > { %2083 = vmatpush3.bf16.msra.mxu1 %v2306_v36 }
 0x123   : > { %2084 = vmatprep.subr.bf16.mxu1 %v2308_v38 }
 0x124   : > { %2145 = vmatpush3.bf16.msra.mxu0 %v2307_v37 }
 0x125   : > { %2146 = vmatprep.subr.bf16.mxu0 %v2309_v39 }
 0x126   : > { %2085 = vmatpush3.bf16.msra.mxu1 %v2308_v38 }
 0x127   : > { %2086 = vmatprep.subr.bf16.mxu1 %v2310_v40 }
 0x128   : > { %2147 = vmatpush3.bf16.msra.mxu0 %v2309_v39 }
 0x129   : > { %2152 = vmatprep.subr.bf16.mxu0 %v2311_v41 }
 0x12a   : > { %2087 = vmatpush3.bf16.msra.mxu1 %v2310_v40 }
 0x12b   : > { %2149 = vmatmul.mubr.bf16.vlgmr.msra.gmra.mrb[8].mxu0 %v1900_v24  ;;  %2092 = vmatprep.subr.bf16.mxu1 %v2312_v42 }
 0x12c   : > { %2153 = vmatpush3.bf16.msra.mxu0 %v2311_v41  ;;  %2168 = vmatprep.mubr.msk.bf16.mxu0 %vm2679_vm4, %v2689_v7 }
 0x12d   : > { %2089 = vmatmul.mubr.bf16.vlgmr.msra.gmra.mrb[4].mxu1 %v1884_v25  ;;  %2154 = vmatprep.subr.bf16.mxu0 %v2313_v44 }
 0x12e   : > { %2093 = vmatpush3.bf16.msra.mxu1 %v2312_v42  ;;  %2108 = vmatprep.mubr.bf16.mxu1 %v1885_v55  ;;  %v2325_v55 = vld [vmem:[%s2901_s5 + $0xb8] sm:$0xff]  }
 0x12f   : > { %2094 = vmatprep.subr.bf16.mxu1 %v2314_v45 }
 0x130   : > { %2155 = vmatpush3.bf16.msra.mxu0 %v2313_v44 }
 0x131   : > { %2156 = vmatprep.subr.bf16.mxu0 %v2315_v46 }
 0x132   : > { %2095 = vmatpush3.bf16.msra.mxu1 %v2314_v45 }
 0x133   : > { %2096 = vmatprep.subr.bf16.mxu1 %v2316_v47 }
 0x134   : > { %2157 = vmatpush3.bf16.msra.mxu0 %v2315_v46 }
 0x135   : > { %2158 = vmatprep.subr.bf16.mxu0 %v2317_v49 }
 0x136   : > { %2097 = vmatpush3.bf16.msra.mxu1 %v2316_v47 }
 0x137   : > { %2098 = vmatprep.subr.bf16.mxu1 %v2318_v50 }
 0x138   : > { %2159 = vmatpush3.bf16.msra.mxu0 %v2317_v49 }
 0x139   : > { %2160 = vmatprep.subr.bf16.mxu0 %v2319_v43 }
 0x13a   : > { %2099 = vmatpush3.bf16.msra.mxu1 %v2318_v50 }
 0x13b   : > { %2100 = vmatprep.subr.bf16.mxu1 %v2320_v48 }
 0x13c   : > { %2161 = vmatpush3.bf16.msra.mxu0 %v2319_v43 }
 0x13d   : > { %2162 = vmatprep.subr.bf16.mxu0 %v2321_v51 }
 0x13e   : > { %2101 = vmatpush3.bf16.msra.mxu1 %v2320_v48 }
 0x13f   : > { %2102 = vmatprep.subr.bf16.mxu1 %v2322_v52 }
 0x140   : > { %2163 = vmatpush3.bf16.msra.mxu0 %v2321_v51 }
 0x141   : > { %2164 = vmatprep.subr.bf16.mxu0 %v2323_v53 }
 0x142   : > { %2103 = vmatpush3.bf16.msra.mxu1 %v2322_v52 }
 0x143   : > { %2104 = vmatprep.subr.bf16.mxu1 %v2324_v54 }
 0x144   : > { %2165 = vmatpush3.bf16.msra.mxu0 %v2323_v53 }
 0x145   : > { %2166 = vmatprep.subr.bf16.mxu0 %v2325_v55 }
 0x146   : > { %2105 = vmatpush3.bf16.msra.mxu1 %v2324_v54 }
 0x147   : > { %2106 = vmatprep.subr.bf16.mxu1 %v2326_v56 }
 0x148   : > { %2167 = vmatpush3.bf16.msra.mxu0 %v2325_v55 }
 0x14a   : > { %2107 = vmatpush3.bf16.msra.mxu1 %v2326_v56 }
 0x14b   : > { %2169 = vmatmul.mubr.msk.bf16.vlgmr.msra.gmra.mrb[8].mxu0 %vm2679_vm4, %v2720_v27 }
 0x14d   : > { %2109 = vmatmul.mubr.bf16.vlgmr.msra.gmra.mrb[4].mxu1 %v1886_v16 }
 0x21e   : > { %v2170_v57 = vpop.f32.mrb[8].mxu0 }
 0x21f   : > { %v1467_v58 = vpop.f32.mrb[9].mxu0 }
 0x220   : > { %v2110_v60 = vpop.f32.mrb[4].mxu1  ;;  %v2171_v62 = vpop.f32.mrb[10].mxu0 }
 0x221   : > { %v2172_v63 = vadd.f32 %v2170_v57, %v2110_v60  ;;  %v1083_v59 = vpop.f32.mrb[5].mxu1  ;;  %v1470_v0 = vpop.f32.mrb[11].mxu0 }
 0x222   : > { %v2173_v1 = vadd.f32 %v1467_v58, %v1083_v59  ;;  %v2111_v2 = vpop.f32.mrb[6].mxu1 }
 0x223   : > { %v1495_v3 = vadd.f32 %v2172_v63, %v1852_v61  ;;  %v2174_v4 = vadd.f32 %v2171_v62, %v2111_v2  ;;  %v1086_v5 = vpop.f32.mrb[7].mxu1 }
 0x224   : > { %v1493_v6 = vadd.f32 %v2173_v1, %v1852_v61  ;;  %v2175_v7 = vadd.f32 %v1470_v0, %v1086_v5 }
 0x225   : > { %v1496_v8 = vadd.f32 %v2174_v4, %v1852_v61  ;;  %v1499_v10 = vmax.f32 %v1495_v3, 0.0 }
 0x226   : > { %v1494_v9 = vadd.f32 %v2175_v7, %v1852_v61  ;;  %v1497_v12 = vmax.f32 %v1493_v6, 0.0 }
 0x227   : > { %v1500_v11 = vmax.f32 %v1496_v8, 0.0 }
 0x228   : > { %v1498_v13 = vmax.f32 %v1494_v9, 0.0 }
 0x229   : > { %v1945_v14 = vpack.c.bf16 %v1500_v11, %v1499_v10 }
 0x22a   : > { %v1940_v15 = vpack.c.bf16 %v1498_v13, %v1497_v12 }
 0x22b   : > { %1950 = vst [vmem:[%s360_s0 + $0x8] sm:$0xff] %v1945_v14  }
 0x22c   : > { %1941 = vst [vmem:[%s360_s0] sm:$0xff] %v1940_v15  }
 0x22d   : > { %2340 = shalt.err (!%p2337_p10)
}
 0x22e   : > { %s2341_s13 = scalar_lea.hbm %s2838_s25, 256  ;;  %s2345_s24 = scalar_lea.hbm %s2904_s8, 1024 }
 0x22f   : > { %p2342_p11 = scmp.ne.s32.totalorder %s2838_s25, %s2341_s13  ;;  %p2346_p0 = scmp.lt.u32.totalorder %s2838_s25, %s2904_s8 }
 0x230   : > { %p2347_p1 = scmp.lt.u32.totalorder %s2345_s24, %s2341_s13  ;;  %p2349_p4 = scmp.lt.u32.totalorder %s2341_s13, %s2838_s25 }
 0x231   : > { %p2343_p12 = pnand %p2342_p11, %p2524_p3 }
 0x232   : > { %p2348_p2 = por %p2347_p1, %p2346_p0 }
 0x233   : > { %p2344_p13 = pneg %p2343_p12 }
 0x234   : > { %p2350_p5 = por %p2349_p4, %p2348_p2 }
 0x236   : > { %p2351_p6 = pnand %p2350_p5, %p2344_p13 }
 0x238   : > { %2354 = shalt.err (!%p2351_p6)
}
 0x239   : > { %s2426_s30 = smov 64   ;;  %s2427_s9 = smov 4  }
 0x23a   : > { %2192 = dma.vmem_to_hbm [thread:$0]  (%p2524_p3), %s2840_s11, 256, %s2838_s25, %s2844_s26, %s2426_s30, %s2426_s30, %s2427_s9  }
 0x23b PF: > { %p2198_p7 = scmp.ge.s32.totalorder %s2421_s12, 2  ;;  %s1577_s17 = sand.u32 1, %s2393_s27  }
 0x23c   : > { %s1578_s14 = scalar_lea.sflag [#allocation3], %s1577_s17 }
 0x23d   : > { %p2195_p9 = pnand %p2198_p7, %p2533_p8 }
 0x23f   : > { %2388 = dma.done.wait (!%p2195_p9), %s1578_s14, 256  }
 0x240   : > { %2390 = vsyncadd (!%p2195_p9), %s1578_s14, 4294967040  ;;  %s22_s12 = sadd.s32 1, %s2421_s12   ;;  %s2919_s9 = sld [smem:[#allocation5_spill]] }
 0x241   : > { %p19_p10 = scmp.ge.s32.totalorder %s22_s12, 6   ;;  %s2920_s18 = sld [smem:[#allocation6_spill]] }
 0x242   : > { %s2921_s11 = sld [smem:[#allocation7_spill]]  ;;  %s2922_s27 = smov %s2397_s28 }
 0x243   : > { %s2923_s28 = smov %s2401_s29  ;;  %s2924_s29 = smov %s2542_s23 }
 0x244   : > { %s2925_s30 = smov %s2413_s10  ;;  %21 = sbr.rel (!%p19_p10) target bundleno = 7 (0x7), region = 102 }
 0x247   : > { %s2926_s10 = smov %s2920_s18 }
 0x24b   :  { %1583 = vsyncpa [#allocation3], 1 }
 0x24c   :  { %1585 = vsyncpa [#allocation3 + $0x1], 1 }

</bundles_post_ra>
